<compile_context>
chip_gen: v7x
topology: tpu7x:2x2x1
jax: 0.10.0
libtpu: 0.0.40
codegen_flags: <defaults>
</compile_context>

<pallas_src>
import jax
import jax.numpy as jnp
from jax import lax
from jax.experimental import pallas as pl
from jax.experimental.pallas import tpu as pltpu


def _self_output_kernel(x_ref, w_ref, b_ref, res_ref, o_ref):
    # x_ref:   (TM, H)       activations tile
    # w_ref:   (H_out, H_in) full weight, PyTorch layout (VMEM-resident)
    # b_ref:   (1, H)        bias (VMEM-resident)
    # res_ref: (TM, H)       residual tile
    # o_ref:   (TM, H)       output tile
    x = x_ref[...]
    w = w_ref[...]
    # x @ W^T without materializing a transpose: contract x's dim 1 with w's dim 1.
    acc = lax.dot_general(
        x, w,
        dimension_numbers=(((1,), (1,)), ((), ())),
        preferred_element_type=jnp.float32)
    acc = acc + b_ref[...].astype(jnp.float32)
    # TODO(synk): training-mode dropout (pltpu.prng_*) not implemented; eval-mode
    # dropout is identity, which matches the reference module in .eval().
    acc = acc + res_ref[...].astype(jnp.float32)
    o_ref[...] = acc.astype(o_ref.dtype)


def _pick_tm(M, H, itemsize, vmem_budget_bytes=28 * 1024 * 1024, tm_cap=512):
    """Largest row-tile (multiple of the sublane count) fitting the VMEM budget.

    Budget model: 2 buffers x (x, res, out) tiles + 2 buffers x resident weight.
    """
    sublane = 16 if itemsize < 4 else 8
    if M <= tm_cap:
        # Small problem: one tile covering M, rounded up to the sublane count.
        return max(sublane, -(-M // sublane) * sublane)
    avail = vmem_budget_bytes - 2 * H * H * itemsize
    tm = avail // (6 * H * itemsize)
    tm = max(sublane, min(int(tm), tm_cap))
    return (tm // sublane) * sublane


def bert_self_output_no_ln(hidden_states, input_tensor, weight, bias):
    """hidden_states, input_tensor: [B, S, H]; weight: [H_out, H_in] (PyTorch layout); bias: [H_out]."""
    B, S, H = hidden_states.shape
    M = B * S
    dtype = hidden_states.dtype
    itemsize = jnp.dtype(dtype).itemsize

    x2d = hidden_states.reshape(M, H)
    r2d = input_tensor.reshape(M, H)
    # Keep PyTorch [out, in] layout; the transpose happens inside dot_general on
    # the MXU, avoiding a per-call HBM transpose. Match the activation dtype so
    # the MXU gets bf16 operands when activations are bf16 (f32 accumulate).
    w = weight.astype(dtype)
    b2d = bias.reshape(1, H)

    TM = _pick_tm(M, H, itemsize)
    num_m = pl.cdiv(M, TM)

    # Double-buffered activation tiles + resident weight/bias, with headroom.
    vmem_needed = 2 * 3 * TM * H * itemsize + 2 * H * H * itemsize + 2 * H * itemsize
    vmem_limit = int(min(max(vmem_needed * 3 // 2 + (2 << 20), 8 << 20), 64 << 20))

    cost = pl.CostEstimate(
        flops=2 * M * H * H,
        bytes_accessed=itemsize * (3 * M * H + H * H + H),
        transcendentals=0)

    out2d = pl.pallas_call(
        _self_output_kernel,
        out_shape=jax.ShapeDtypeStruct((M, H), dtype),
        grid_spec=pltpu.PrefetchScalarGridSpec(
            num_scalar_prefetch=0,
            grid=(num_m,),
            in_specs=[
                pl.BlockSpec((TM, H), lambda i: (i, 0)),   # x tile (pipelined)
                pl.BlockSpec((H, H), lambda i: (0, 0)),    # weight (resident)
                pl.BlockSpec((1, H), lambda i: (0, 0)),    # bias (resident)
                pl.BlockSpec((TM, H), lambda i: (i, 0)),   # residual tile
            ],
            out_specs=pl.BlockSpec((TM, H), lambda i: (i, 0)),
        ),
        compiler_params=pltpu.CompilerParams(
            dimension_semantics=("parallel",),
            vmem_limit_bytes=vmem_limit),
        cost_estimate=cost,
    )(x2d, w, b2d, r2d)

    return out2d.reshape(B, S, H)


if __name__ == "__main__":
    B, S, H = 2, 8, 32  # batch, seq, hidden_size (small smoke-test shapes)
    key = jax.random.PRNGKey(0)
    k_x, k_res, k_w, k_b = jax.random.split(key, 4)

    hidden_states = jax.random.normal(k_x, (B, S, H), dtype=jnp.float32)
    input_tensor = jax.random.normal(k_res, (B, S, H), dtype=jnp.float32)
    # PyTorch nn.Linear parameter shapes: W [H_out, H_in], b [H_out].
    weight = jax.random.normal(k_w, (H, H), dtype=jnp.float32) * 0.02
    bias = jax.random.normal(k_b, (H,), dtype=jnp.float32) * 0.02

    out = bert_self_output_no_ln(hidden_states, input_tensor, weight, bias)
    jax.block_until_ready(out)

    # Reference (plain JAX): dense + eval-dropout (identity) + residual.
    ref = hidden_states @ weight.T + bias + input_tensor
    assert jnp.allclose(out, ref, atol=1e-5, rtol=1e-5), "mismatch vs reference"

    print("KERNEL_OK")
</pallas_src>

<mosaic_0001>
module attributes {stable_mosaic.version = 11 : i64} {
  func.func @_self_output_kernel(%arg0: i32, %arg1: memref<16x32xf32, #tpu.memory_space<vmem>>, %arg2: memref<32x32xf32, #tpu.memory_space<vmem>>, %arg3: memref<1x32xf32, #tpu.memory_space<vmem>>, %arg4: memref<16x32xf32, #tpu.memory_space<vmem>>, %arg5: memref<16x32xf32, #tpu.memory_space<vmem>>) attributes {dimension_semantics = [#tpu.dimension_semantics<parallel>], iteration_bounds = array<i64: 1>, scalar_prefetch = 0 : i64, scratch_operands = 0 : i64, tpu.core_type = #tpu.core_type<tc>, window_params = [{transform_indices = @transform_0, window_bounds = array<i64: 16, 32>}, {pipeline_mode = #tpu.pipeline_mode<synchronous>, transform_indices = @transform_1, window_bounds = array<i64: 32, 32>}, {pipeline_mode = #tpu.pipeline_mode<synchronous>, transform_indices = @transform_2, window_bounds = array<i64: 1, 32>}, {transform_indices = @transform_3, window_bounds = array<i64: 16, 32>}, {transform_indices = @transform_4, window_bounds = array<i64: 16, 32>}]} {
    %c0 = arith.constant 0 : index
    %c0_0 = arith.constant 0 : index
    %0 = vector.load %arg1[%c0, %c0_0] : memref<16x32xf32, #tpu.memory_space<vmem>>, vector<16x32xf32>
    %c0_1 = arith.constant 0 : index
    %c0_2 = arith.constant 0 : index
    %1 = vector.load %arg2[%c0_1, %c0_2] : memref<32x32xf32, #tpu.memory_space<vmem>>, vector<32x32xf32>
    %cst = arith.constant dense<0.000000e+00> : vector<16x32xf32>
    %2 = tpu.matmul %0, %1, %cst {dimension_numbers = #tpu.dot_dimension_numbers<[1], [1], [0], [0], [0, 0, 1, 0], [], []>} : vector<16x32xf32>, vector<32x32xf32>, vector<16x32xf32> -> vector<16x32xf32>
    %c0_3 = arith.constant 0 : index
    %c0_4 = arith.constant 0 : index
    %3 = vector.load %arg3[%c0_3, %c0_4] : memref<1x32xf32, #tpu.memory_space<vmem>>, vector<1x32xf32>
    %4 = vector.broadcast %3 : vector<1x32xf32> to vector<16x32xf32>
    %5 = arith.addf %2, %4 : vector<16x32xf32>
    %c0_5 = arith.constant 0 : index
    %c0_6 = arith.constant 0 : index
    %6 = vector.load %arg4[%c0_5, %c0_6] : memref<16x32xf32, #tpu.memory_space<vmem>>, vector<16x32xf32>
    %7 = arith.addf %5, %6 : vector<16x32xf32>
    %c0_7 = arith.constant 0 : index
    %c0_8 = arith.constant 0 : index
    %8 = vector.load %arg5[%c0_7, %c0_8] : memref<16x32xf32, #tpu.memory_space<vmem>>, vector<16x32xf32>
    tpu.vector_store %arg5[%c0_7, %c0_8], %7 {strides = array<i32>} : memref<16x32xf32, #tpu.memory_space<vmem>>, vector<16x32xf32>,
    return
  }
  func.func @transform_0(%arg0: i32) -> (i32, i32) {
    %c0_i32 = arith.constant 0 : i32
    %c0_i32_0 = arith.constant 0 : i32
    return %arg0, %c0_i32 : i32, i32
  }
  func.func @transform_1(%arg0: i32) -> (i32, i32) {
    %c0_i32 = arith.constant 0 : i32
    %c0_i32_0 = arith.constant 0 : i32
    %c0_i32_1 = arith.constant 0 : i32
    return %c0_i32, %c0_i32_0 : i32, i32
  }
  func.func @transform_2(%arg0: i32) -> (i32, i32) {
    %c0_i32 = arith.constant 0 : i32
    %c0_i32_0 = arith.constant 0 : i32
    %c0_i32_1 = arith.constant 0 : i32
    return %c0_i32, %c0_i32_0 : i32, i32
  }
  func.func @transform_3(%arg0: i32) -> (i32, i32) {
    %c0_i32 = arith.constant 0 : i32
    %c0_i32_0 = arith.constant 0 : i32
    return %arg0, %c0_i32 : i32, i32
  }
  func.func @transform_4(%arg0: i32) -> (i32, i32) {
    %c0_i32 = arith.constant 0 : i32
    %c0_i32_0 = arith.constant 0 : i32
    return %arg0, %c0_i32 : i32, i32
  }
}

</mosaic_0001>

<bundles_post_ra>
// kernel: tpu_custom_call.1
= control target key start
LH: loop header
LB: loop body
LE: loop exit
PB: predicated region body
PF: predicated region fallthrough
CT: control target
= control target key end

     0   :  { %9 = vsyncpa [#allocation3], 0  ;;  %s433_s0 = inlined_call_operand.hbm [shape: f32[16,32], index: 0, kind: input, shape index: {}]   ;;  %s434_s1 = inlined_call_operand.hbm [shape: f32[32,32], index: 1, kind: input, shape index: {}]   ;;  %s435_s2 = inlined_call_operand.vmem [shape: f32[1,32], index: 2, kind: input, shape index: {}]   ;;  %s436_s3 = inlined_call_operand.hbm [shape: f32[16,32], index: 3, kind: input, shape index: {}]   ;;  %s437_s4 = inlined_call_operand.hbm [shape: f32[16,32], index: 4, kind: output, shape index: {}]  }
   0x1   :  { %10 = vsyncpa [#allocation6], 0 }
   0x2   :  { %11 = vsyncpa [#allocation4], 0  ;;  %s326_s15 = smov [#allocation5]   ;;  %s327_s17 = smov [#allocation2]  }
   0x3   :  { %s29_s16 = sshll.u32 %s326_s15, 4  ;;  %s17_s18 = sshll.u32 %s327_s17, 4  ;;  %s30_s16 = int_to_ptr.vmem [resolvable:$true] %s29_s16  ;;  %s357_s18 = int_to_ptr.vmem [resolvable:$true] %s17_s18 }
   0x4   :  { %s232_s21 = scalar_lea.hbm %s434_s1, 512 }
   0x5   :  { %p233_p0 = scmp.ne.s32.totalorder %s434_s1, %s232_s21  ;;  %p236_p1 = scmp.lt.u32.totalorder %s232_s21, %s434_s1 }
   0x7   :  { %p238_p2 = pnand %p236_p1, %p233_p0 }
   0x9   :  { %241 = shalt.err (!%p238_p2)
}
   0xa   :  { %s242_s26 = scalar_lea.vmem %s30_s16, 512  ;;  %p247_p4 = scmp.lt.s32.totalorder %s30_s16, %s30_s16 }
   0xb   :  { %p243_p3 = scmp.ne.s32.totalorder %s30_s16, %s242_s26  ;;  %p248_p5 = scmp.lt.s32.totalorder %s242_s26, %s242_s26 }
   0xd   :  { %p249_p6 = por %p248_p5, %p247_p4 }
   0xf   :  { %p250_p7 = pnand %p249_p6, %p243_p3 }
  0x11   :  { %253 = shalt.err (!%p250_p7)
}
  0x12   :  { %s328_s27 = smov 128   ;;  %s329_s28 = smov 8  }
  0x13   :  { %35 = dma.hbm_to_vmem [thread:$0]  %s434_s1, 512, %s30_s16, [#allocation6], %s328_s27, %s328_s27, %s329_s28  }
  0x14   :  { %s254_s7 = scalar_lea.hbm %s433_s0, 256 }
  0x15   :  { %p255_p8 = scmp.ne.s32.totalorder %s433_s0, %s254_s7  ;;  %p258_p9 = scmp.lt.u32.totalorder %s254_s7, %s433_s0 }
  0x17   :  { %p260_p10 = pnand %p258_p9, %p255_p8 }
  0x19   :  { %263 = shalt.err (!%p260_p10)
}
  0x1a   :  { %s264_s12 = scalar_lea.vmem %s357_s18, 256  ;;  %p269_p12 = scmp.lt.s32.totalorder %s357_s18, %s357_s18 }
  0x1b   :  { %p265_p11 = scmp.ne.s32.totalorder %s357_s18, %s264_s12  ;;  %p270_p13 = scmp.lt.s32.totalorder %s264_s12, %s264_s12 }
  0x1d   :  { %p271_p0 = por %p270_p13, %p269_p12 }
  0x1f   :  { %p272_p1 = pnand %p271_p0, %p265_p11 }
  0x21   :  { %275 = shalt.err (!%p272_p1)
}
  0x22   :  { %23 = dma.hbm_to_vmem [thread:$0]  %s433_s0, 256, %s357_s18, [#allocation3], %s328_s27, %s328_s27, %s329_s28  }
  0x23   :  { %s330_s14 = smov [#allocation7]   ;;  %s276_s19 = scalar_lea.hbm %s436_s3, 256 }
  0x24   :  { %s43_s15 = sshll.u32 %s330_s14, 4  ;;  %p277_p2 = scmp.ne.s32.totalorder %s436_s3, %s276_s19  ;;  %s44_s15 = int_to_ptr.vmem [resolvable:$true] %s43_s15 }
  0x25   :  { %p280_p3 = scmp.lt.u32.totalorder %s276_s19, %s436_s3 }
  0x27   :  { %p282_p4 = pnand %p280_p3, %p277_p2 }
  0x29   :  { %285 = shalt.err (!%p282_p4)
}
  0x2a   :  { %s286_s24 = scalar_lea.vmem %s44_s15, 256  ;;  %p291_p6 = scmp.lt.s32.totalorder %s44_s15, %s44_s15 }
  0x2b   :  { %p287_p5 = scmp.ne.s32.totalorder %s44_s15, %s286_s24  ;;  %p292_p7 = scmp.lt.s32.totalorder %s286_s24, %s286_s24 }
  0x2d   :  { %p293_p8 = por %p292_p7, %p291_p6 }
  0x2f   :  { %p294_p9 = pnand %p293_p8, %p287_p5 }
  0x31   :  { %297 = shalt.err (!%p294_p9)
}
  0x32   :  { %49 = dma.hbm_to_vmem [thread:$0]  %s436_s3, 256, %s44_s15, [#allocation6], %s328_s27, %s328_s27, %s329_s28  }
  0x33   :  { %320 = dma.done.wait [#allocation3], 256  }
  0x34   :  { %321 = vsyncadd [#allocation3], 4294967040 }
  0x35   :  { %322 = dma.done.wait [#allocation6], 768  }
  0x36   :  { %323 = vsyncadd [#allocation6], 4294966528  ;;  %vm72_vm0 = vcmask 261120   ;;  %v61_v0 = vld [vmem:[#allocation5] sm:$0xff]  ;;  %v62_v1 = vld [vmem:[#allocation5 + $0x8] sm:$0xff]  ;;  %s331_s26 = smov [#allocation8]  }
  0x37   :  { %vm215_vm1 = vmpackc.low %vm72_vm0, %vm72_vm0  ;;  %v63_v2 = vld [vmem:[#allocation5 + $0x10] sm:$0xff]  ;;  %v214_v3 = vpack.c.bf16 %v62_v1, %v61_v0  ;;  %v64_v4 = vld [vmem:[#allocation5 + $0x18] sm:$0xff]  ;;  %s177_s29 = sshll.u32 %s331_s26, 4  ;;  %s178_s29 = int_to_ptr.vmem [resolvable:$true] %s177_s29 }
  0x38   :  { %v59_v5 = vld [vmem:[#allocation2] sm:$0xff]  ;;  %v220_v6 = vpack.c.bf16 %v64_v4, %v63_v2  ;;  %v60_v7 = vld [vmem:[#allocation2 + $0x8] sm:$0xff]  ;;  %v167_v10 = vld [vmem:[#allocation7 + $0x8] sm:$0xff]  ;;  %s298_s30 = scalar_lea.vmem %s178_s29, 256  ;;  %p303_p11 = scmp.lt.s32.totalorder %s178_s29, %s178_s29 }
  0x39   :  { %211 = vmatprep.mubr.msk.f32.mxu0 %vm72_vm0, %v59_v5  ;;  %216 = vmatprep.subr.msk.bf16.mxu0 %vm215_vm1, %v214_v3  ;;  %v190_v8 = vld [vmem:[%s435_s2] ss:$0 sm:$0xff]  ;;  %v166_v13 = vld [vmem:[#allocation7] sm:$0xff]  ;;  %p299_p10 = scmp.ne.s32.totalorder %s178_s29, %s298_s30  ;;  %p304_p12 = scmp.lt.s32.totalorder %s298_s30, %s298_s30 }
  0x3a   :  { %219 = vmatpush3.bf16.xpose.msk.msra.mxu0 %vm215_vm1, %v214_v3 }
  0x3b   :  { %222 = vmatprep.subr.msk.bf16.mxu0 %vm215_vm1, %v220_v6  ;;  %p305_p13 = por %p304_p12, %p303_p11 }
  0x3d   :  { %p306_p0 = pnand %p305_p13, %p299_p10 }
  0x42   :  { %225 = vmatpush3.bf16.xpose.msk.msra.mxu0 %vm215_vm1, %v220_v6 }
  0x49   :  { %212 = vmatmul.mubr.msk.f32.vlgmr.msra.gmra.mrb[0].mxu0 %vm72_vm0, %v60_v7 }
 0x11c   :  { %v213_v9 = vpop.f32.mrb[0].mxu0 }
 0x11d   :  { %v163_v11 = vadd.f32 %v213_v9, %v190_v8  ;;  %v157_v12 = vpop.f32.mrb[1].mxu0 }
 0x11e   :  { %v158_v14 = vadd.f32 %v190_v8, %v157_v12 }
 0x11f   :  { %v169_v15 = vadd.f32 %v167_v10, %v163_v11 }
 0x120   :  { %v168_v16 = vadd.f32 %v166_v13, %v158_v14 }
 0x121   :  { %171 = vst.msk [vmem:[#allocation8 + $0x8] sm:$0xff] %vm72_vm0, %v169_v15 }
 0x122   :  { %170 = vst.msk [vmem:[#allocation8] sm:$0xff] %vm72_vm0, %v168_v16 }
 0x123   :  { %309 = shalt.err (!%p306_p0)
}
 0x124   :  { %s310_s6 = scalar_lea.hbm %s437_s4, 256 }
 0x125   :  { %p311_p1 = scmp.ne.s32.totalorder %s437_s4, %s310_s6  ;;  %p314_p2 = scmp.lt.u32.totalorder %s310_s6, %s437_s4 }
 0x127   :  { %p316_p3 = pnand %p314_p2, %p311_p1 }
 0x129   :  { %319 = shalt.err (!%p316_p3)
}
 0x12a   :  { %183 = dma.vmem_to_hbm [thread:$0]  %s178_s29, 256, %s437_s4, [#allocation4], %s328_s27, %s328_s27, %s329_s28  }
 0x12b   :  { %324 = dma.done.wait [#allocation4], 256  }
 0x12c   :  { %325 = vsyncadd [#allocation4], 4294967040 }
 0x12d   :  { %187 = vsyncpa [#allocation3], 1 }
 0x12e   :  { %188 = vsyncpa [#allocation6], 1 }
 0x12f   :  { %189 = vsyncpa [#allocation4], 1 }

</bundles_post_ra>
